<compile_context>
chip_gen: v6e
topology: v6e:2x2x1
jax: 0.10.0
libtpu: 0.0.40
codegen_flags: <defaults>
</compile_context>

<pallas_src>
import jax
import jax.numpy as jnp
from jax.experimental import pallas as pl
from jax.experimental.pallas import tpu as pltpu

BN_EPS = 1e-5


def _round_up(x: int, m: int) -> int:
    return (x + m - 1) // m * m


def _cdiv(a: int, b: int) -> int:
    return -(-a // b)


def _tpu_vmem_capacity_bytes() -> int:
    try:
        return int(pltpu.get_tpu_info().vmem_capacity_bytes)
    except Exception:
        return 64 * 1024 * 1024          # conservative (v7x-sized) fallback


# ---------------------------------------------------------------------------
# Phase 1: fused graph-agg + 1x1 convs (single MXU matmul per tile) + partial
#          sum-of-squares for BatchNorm (from the f32 accumulator, pre-downcast)
# ---------------------------------------------------------------------------
def _matmul_sq_kernel(x_ref, b_ref, y_ref, sq_ref):
    # x_ref : (tile_nt, CVp)      activations, rows = (n,t) samples  [compute dtype]
    # b_ref : (CVp, tile_ov)      folded-operator column panel       [compute dtype]
    # y_ref : (tile_nt, tile_ov)  pre-BN output tile                 [compute dtype]
    # sq_ref: (8, tile_ov)        per-tile partial sum of squares    [f32]
    y = jnp.dot(x_ref[...], b_ref[...], preferred_element_type=jnp.float32)
    y2 = y * y
    # Reduce tile_nt rows down to 8 sublanes with pure per-vreg VALU adds
    # (no cross-sublane XLU reduction); the final 8-row fold happens in JAX.
    part = y2[0:8, :]
    for g in range(1, y.shape[0] // 8):
        part = part + y2[g * 8:(g + 1) * 8, :]
    sq_ref[...] = part
    y_ref[...] = y.astype(y_ref.dtype)


# ---------------------------------------------------------------------------
# Phase 2: folded BatchNorm affine (per-lane scale/shift) + ReLU
# ---------------------------------------------------------------------------
def _bn_relu_kernel(y_ref, scale_ref, shift_ref, o_ref):
    y = y_ref[...].astype(jnp.float32)
    out = y * scale_ref[...] + shift_ref[...]
    o_ref[...] = jnp.maximum(out, 0.0).astype(o_ref.dtype)


# ---------------------------------------------------------------------------
# Wrapper
# ---------------------------------------------------------------------------
def unit_gcn_forward(x, A, conv_w, bn_gamma, bn_beta, mask=None, *,
                     tile_nt=None, tile_ov=None,
                     compute_dtype=jnp.bfloat16, return_nt_layout=False):
    """unit_gcn forward. x: (N,C,T,V); A: (K,V,V); conv_w: (K,O,C); bn_*: (O,).

    Returns (N, O, T, V) in x.dtype, or the lane-dense (N*T, O*V) slab when
    return_nt_layout=True (lets a fused downstream block skip the HBM transpose).
    """
    N, C, T, V = x.shape
    K, O, Cin = conv_w.shape
    assert Cin == C and A.shape == (K, V, V)

    if mask is not None:                      # mask_learning path: A <- A * mask
        A = A * mask
    # TODO(synk): space_mask branch (per-sample adjacency), BN running-stat
    # updates and the use_local_bn variant are not implemented.

    cdt = jnp.dtype(compute_dtype)
    out_dtype = jnp.dtype(x.dtype)
    csz = cdt.itemsize
    osz = out_dtype.itemsize
    CV, OV = C * V, O * V
    NT = N * T

    # ---- generation-aware VMEM budget (v5e/v6e: 128 MiB, v7x: 64 MiB) -------
    cap = _tpu_vmem_capacity_bytes()
    budget = min(int(cap * 0.70), 96 * 1024 * 1024)        # tile-sizing budget
    vmem_limit = min(int(cap * 0.85), 112 * 1024 * 1024)   # compiler limit

    # ---- lane padding: CV / OV up to multiples of 128 ------------------------
    CVp = _round_up(CV, 128)
    OV128 = _round_up(OV, 128)

    # ---- B column-panel width (keeps B off full-VMEM residency on v7x) ------
    if tile_ov is None:
        max_cols = (int(budget * 0.4) // max(2 * CVp * csz, 1) // 128) * 128
        cand = min(OV128, max(128, max_cols))
        tile_ov = 128
        for t in range(cand, 0, -128):       # largest 128-multiple dividing OV128
            if OV128 % t == 0:
                tile_ov = t
                break
    tile_ov = max(128, (int(tile_ov) // 128) * 128)
    tile_ov = min(tile_ov, OV128)
    OVp = _round_up(OV, tile_ov)
    num_ov = OVp // tile_ov

    # ---- phase-1 row tile (big M tiles keep the MXU busy, amortize steps) ---
    fixed = 2 * CVp * tile_ov * csz + 2 * 8 * tile_ov * 4   # dbl-buffered B panel + sq
    per_row = 2 * (CVp + tile_ov) * csz + 8 * tile_ov       # x/y tiles (x2) + f32 temps
    if tile_nt is None:
        rows = max(8, (budget - fixed) // max(per_row, 1))
        rows = min(rows, 1024)
        tile_nt = (rows // 128) * 128 if rows >= 128 else (rows // 8) * 8
    tile_nt = max(8, (int(tile_nt) // 8) * 8)
    tile_nt = min(tile_nt, _round_up(NT, 8))

    # ---- phase-2 row tile: a multiple of tile_nt (phase 2 has no B panel) ---
    per_row_p2 = 2 * OVp * (csz + osz) + 4 * OVp
    rows_p2 = max(8, (budget - 4 * OVp * 4) // max(per_row_p2, 1))
    f = max(1, min(rows_p2 // tile_nt, max(1, 1024 // tile_nt), _cdiv(NT, tile_nt)))
    tile_p2 = f * tile_nt

    NT_pad = _round_up(NT, tile_p2)
    num_nt = NT_pad // tile_nt
    num_p2 = NT_pad // tile_p2

    # ---- fold the K graph aggregations + 1x1 convs into one dense operator --
    #   B[(c,v),(o,w)] = sum_k W_k[o,c] * A_k[v,w]     (built in f32, cast once)
    Bmat = jnp.einsum("koc,kvw->cvow", conv_w.astype(jnp.float32),
                      A.astype(jnp.float32)).reshape(CV, OV)
    Bmat = jnp.pad(Bmat, ((0, CVp - CV), (0, OVp - OV))).astype(cdt)

    # (N,C,T,V) -> (N*T, C*V): lane-dense sample rows, zero-padded (pad rows /
    # cols are zero, so they contribute nothing to the BN statistics).
    x2 = jnp.transpose(x, (0, 2, 1, 3)).reshape(NT, CV).astype(cdt)
    x2 = jnp.pad(x2, ((0, NT_pad - NT), (0, CVp - CV)))

    # -------- Phase 1: matmul + per-tile partial sum-of-squares --------------
    flops1 = 2 * NT_pad * CVp * OVp
    bytes1 = (num_ov * NT_pad * CVp * csz + CVp * OVp * csz
              + NT_pad * OVp * csz + 8 * num_nt * OVp * 4)
    y_pre, sq = pl.pallas_call(
        _matmul_sq_kernel,
        out_shape=(jax.ShapeDtypeStruct((NT_pad, OVp), cdt),
                   jax.ShapeDtypeStruct((8 * num_nt, OVp), jnp.float32)),
        grid=(num_ov, num_nt),          # OV panels outer -> B panel reused over NT
        in_specs=[
            pl.BlockSpec((tile_nt, CVp), lambda j, i: (i, 0)),
            pl.BlockSpec((CVp, tile_ov), lambda j, i: (0, j)),
        ],
        out_specs=(
            pl.BlockSpec((tile_nt, tile_ov), lambda j, i: (i, j)),
            pl.BlockSpec((8, tile_ov), lambda j, i: (i, j)),
        ),
        compiler_params=pltpu.CompilerParams(
            dimension_semantics=("parallel", "parallel"),
            vmem_limit_bytes=vmem_limit),
        cost_estimate=pl.CostEstimate(flops=int(flops1), transcendentals=0,
                                      bytes_accessed=int(bytes1)),
    )(x2, Bmat)

    # -------- Tiny JAX fold: batch statistics -> per-lane affine -------------
    # sum(y) over rows == colsum(x2) @ B, so no row-sum is needed in-kernel.
    colsum = jnp.sum(x2.astype(jnp.float32), axis=0, keepdims=True)     # (1, CVp)
    ysum = jnp.dot(colsum, Bmat.astype(jnp.float32))[0]                 # (OVp,)
    sumsq = jnp.sum(sq, axis=0)                                         # (OVp,)
    cnt = jnp.float32(NT * V)
    ch_sum = ysum[:OV].reshape(O, V).sum(axis=1)
    ch_sumsq = sumsq[:OV].reshape(O, V).sum(axis=1)
    mean = ch_sum / cnt
    var = jnp.maximum(ch_sumsq / cnt - mean * mean, 0.0)   # biased; clamp >= 0
    inv_std = jax.lax.rsqrt(var + BN_EPS)
    scale_c = bn_gamma.astype(jnp.float32) * inv_std                    # (O,)
    shift_c = bn_beta.astype(jnp.float32) - mean * scale_c              # (O,)
    scale = jnp.pad(jnp.repeat(scale_c, V), (0, OVp - OV)).reshape(1, OVp)
    shift = jnp.pad(jnp.repeat(shift_c, V), (0, OVp - OV)).reshape(1, OVp)

    # -------- Phase 2: affine BN + ReLU, streamed over larger row tiles ------
    alias = {0: 0} if out_dtype == cdt else {}   # reuse y_pre's HBM buffer
    flops2 = 3 * NT_pad * OVp
    bytes2 = NT_pad * OVp * (csz + osz) + 2 * OVp * 4
    y2 = pl.pallas_call(
        _bn_relu_kernel,
        out_shape=jax.ShapeDtypeStruct((NT_pad, OVp), out_dtype),
        grid=(num_p2,),
        in_specs=[
            pl.BlockSpec((tile_p2, OVp), lambda i: (i, 0)),
            pl.BlockSpec((1, OVp), lambda i: (0, 0)),
            pl.BlockSpec((1, OVp), lambda i: (0, 0)),
        ],
        out_specs=pl.BlockSpec((tile_p2, OVp), lambda i: (i, 0)),
        compiler_params=pltpu.CompilerParams(
            dimension_semantics=("parallel",),
            vmem_limit_bytes=vmem_limit),
        cost_estimate=pl.CostEstimate(flops=int(flops2), transcendentals=0,
                                      bytes_accessed=int(bytes2)),
        input_output_aliases=alias,
    )(y_pre, scale, shift)

    if return_nt_layout:
        return y2[:NT, :OV]                    # lane-dense (N*T, O*V) slab
    return y2[:NT, :OV].reshape(N, T, O, V).transpose(0, 2, 1, 3)


# ---------------------------------------------------------------------------
# Pure-JAX reference (PyTorch train-mode forward)
# ---------------------------------------------------------------------------
def unit_gcn_reference(x, A, conv_w, bn_gamma, bn_beta):
    N, C, T, V = x.shape
    K, O, _ = conv_w.shape
    y = jnp.zeros((N, O, T, V), jnp.float32)
    for i in range(K):
        xa = (x.reshape(-1, V) @ A[i]).reshape(N, C, T, V)
        y = y + jnp.einsum("oc,nctv->notv", conv_w[i], xa)
    mean = jnp.mean(y, axis=(0, 2, 3), keepdims=True)
    var = jnp.mean((y - mean) ** 2, axis=(0, 2, 3), keepdims=True)
    y = (y - mean) * jax.lax.rsqrt(var + BN_EPS)
    y = y * bn_gamma.reshape(1, O, 1, 1) + bn_beta.reshape(1, O, 1, 1)
    return jnp.maximum(y, 0.0)


if __name__ == "__main__":
    def make_inputs(key, N, C, T, V, O, K):
        kx, ka, kw, kg, kb = jax.random.split(key, 5)
        x = jax.random.normal(kx, (N, C, T, V), jnp.float32)
        A_raw = jax.random.uniform(ka, (K, V, V), jnp.float32)
        A = A_raw / jnp.sum(A_raw, axis=-1, keepdims=True)
        conv_w = 0.1 * jax.random.normal(kw, (K, O, C), jnp.float32)
        bn_gamma = 1.0 + 0.1 * jax.random.normal(kg, (O,), jnp.float32)
        bn_beta = 0.1 * jax.random.normal(kb, (O,), jnp.float32)
        return x, A, conv_w, bn_gamma, bn_beta

    # Config A: f32 compute path (tight tolerance); multi-tile NT grid
    # (NT=16, tile_nt=8), CV padded 64->128, phase-2 output aliases y_pre.
    N, C, T, V, O, K = 2, 4, 8, 16, 8, 3
    x, A, W, g, b = make_inputs(jax.random.PRNGKey(0), N, C, T, V, O, K)
    y = unit_gcn_forward(x, A, W, g, b, tile_nt=8, compute_dtype=jnp.float32)
    jax.block_until_ready(y)
    y_ref = unit_gcn_reference(x, A, W, g, b)
    assert y.shape == (N, O, T, V)
    assert jnp.allclose(y, y_ref, atol=2e-3, rtol=2e-3), "mismatch vs reference (A)"

    # Config B: default bf16 compute path; V=25 -> CV/OV padded to 128-multiples,
    # 2x2 grid (2 OV panels x 2 NT tiles), NT padded 14->16, mask_learning on.
    N2, C2, T2, V2, O2, K2 = 2, 8, 7, 25, 16, 2
    x2, A2, W2, g2, b2 = make_inputs(jax.random.PRNGKey(1), N2, C2, T2, V2, O2, K2)
    mask = 1.0 + 0.05 * jax.random.normal(jax.random.PRNGKey(2), (K2, V2, V2),
                                          jnp.float32)
    y2 = unit_gcn_forward(x2, A2, W2, g2, b2, mask=mask, tile_nt=8, tile_ov=256)
    jax.block_until_ready(y2)
    y2_ref = unit_gcn_reference(x2, A2 * mask, W2, g2, b2)
    assert y2.shape == (N2, O2, T2, V2)
    assert jnp.allclose(y2, y2_ref, atol=4e-2, rtol=4e-2), "mismatch vs reference (B)"

    print("KERNEL_OK")
</pallas_src>

<mosaic_0001>
module attributes {stable_mosaic.version = 11 : i64} {
  func.func @_matmul_sq_kernel(%arg0: i32, %arg1: i32, %arg2: memref<8x128xf32, #tpu.memory_space<vmem>>, %arg3: memref<128x128xf32, #tpu.memory_space<vmem>>, %arg4: memref<8x128xf32, #tpu.memory_space<vmem>>, %arg5: memref<8x128xf32, #tpu.memory_space<vmem>>) attributes {dimension_semantics = [#tpu.dimension_semantics<parallel>, #tpu.dimension_semantics<parallel>], iteration_bounds = array<i64: 1, 2>, scalar_prefetch = 0 : i64, scratch_operands = 0 : i64, tpu.core_type = #tpu.core_type<tc>, window_params = [{transform_indices = @transform_0, window_bounds = array<i64: 8, 128>}, {transform_indices = @transform_1, window_bounds = array<i64: 128, 128>}, {transform_indices = @transform_2, window_bounds = array<i64: 8, 128>}, {transform_indices = @transform_3, window_bounds = array<i64: 8, 128>}]} {
    %c0 = arith.constant 0 : index
    %c0_0 = arith.constant 0 : index
    %0 = vector.load %arg2[%c0, %c0_0] : memref<8x128xf32, #tpu.memory_space<vmem>>, vector<8x128xf32>
    %c0_1 = arith.constant 0 : index
    %c0_2 = arith.constant 0 : index
    %1 = vector.load %arg3[%c0_1, %c0_2] : memref<128x128xf32, #tpu.memory_space<vmem>>, vector<128x128xf32>
    %cst = arith.constant dense<0.000000e+00> : vector<8x128xf32>
    %2 = tpu.matmul %0, %1, %cst {dimension_numbers = #tpu.dot_dimension_numbers<[1], [0], [0], [1], [0, 0, 1, 1], [], []>} : vector<8x128xf32>, vector<128x128xf32>, vector<8x128xf32> -> vector<8x128xf32>
    %3 = arith.mulf %2, %2 : vector<8x128xf32>
    %c0_3 = arith.constant 0 : index
    %c0_4 = arith.constant 0 : index
    %4 = vector.load %arg5[%c0_3, %c0_4] : memref<8x128xf32, #tpu.memory_space<vmem>>, vector<8x128xf32>
    tpu.vector_store %arg5[%c0_3, %c0_4], %3 {strides = array<i32>} : memref<8x128xf32, #tpu.memory_space<vmem>>, vector<8x128xf32>,
    %c0_5 = arith.constant 0 : index
    %c0_6 = arith.constant 0 : index
    %5 = vector.load %arg4[%c0_5, %c0_6] : memref<8x128xf32, #tpu.memory_space<vmem>>, vector<8x128xf32>
    tpu.vector_store %arg4[%c0_5, %c0_6], %2 {strides = array<i32>} : memref<8x128xf32, #tpu.memory_space<vmem>>, vector<8x128xf32>,
    return
  }
  func.func @transform_0(%arg0: i32, %arg1: i32) -> (i32, i32) {
    %c0_i32 = arith.constant 0 : i32
    %c0_i32_0 = arith.constant 0 : i32
    return %arg1, %c0_i32 : i32, i32
  }
  func.func @transform_1(%arg0: i32, %arg1: i32) -> (i32, i32) {
    %c0_i32 = arith.constant 0 : i32
    %c0_i32_0 = arith.constant 0 : i32
    return %c0_i32, %arg0 : i32, i32
  }
  func.func @transform_2(%arg0: i32, %arg1: i32) -> (i32, i32) {
    %c0_i32 = arith.constant 0 : i32
    return %arg1, %arg0 : i32, i32
  }
  func.func @transform_3(%arg0: i32, %arg1: i32) -> (i32, i32) {
    %c0_i32 = arith.constant 0 : i32
    return %arg1, %arg0 : i32, i32
  }
}

</mosaic_0001>

<bundles_post_ra>
// kernel: tpu_custom_call.1
= control target key start
LH: loop header
LB: loop body
LE: loop exit
PB: predicated region body
PF: predicated region fallthrough
CT: control target
= control target key end

     0   :  { %9 = vsyncpa [#allocation3], 0  ;;  %s1051_s0 = inlined_call_operand.hbm [shape: f32[16,128], index: 0, kind: input, shape index: {}]   ;;  %s1052_s1 = inlined_call_operand.hbm [shape: f32[128,128], index: 1, kind: input, shape index: {}]   ;;  %s1053_s2 = inlined_call_operand.hbm [shape: f32[16,128], index: 2, kind: output, shape index: {0}]   ;;  %s1054_s3 = inlined_call_operand.hbm [shape: f32[16,128], index: 3, kind: output, shape index: {1}]  }
   0x1   :  { %11 = vsyncpa [#allocation3 + $0x1], 0 }
   0x2   :  { %12 = vsyncpa [#allocation6], 0 }
   0x3   :  { %13 = vsyncpa [#allocation4], 0 }
   0x4   :  { %15 = vsyncpa [#allocation4 + $0x1], 0 }
   0x5   :  { %16 = vsyncpa [#allocation9], 0 }
   0x6   :  { %18 = vsyncpa [#allocation9 + $0x1], 0  ;;  %s833_s12 = smov 0   ;;  %s835_s13 = smov 0  }
   0x7   :  { %s837_s14 = smov 0   ;;  %s839_s15 = smov 0  }
   0x8   :  { %s841_s16 = smov 0   ;;  %s843_s17 = smov 0  }
   0x9 LB: > { %s483_s18 = sadd.s32 4294967295, %s803_s17   ;;  %s484_s19 = sadd.s32 4294967294, %s803_s17   ;;  %s803_s17 = sphi %s843_s17, %s24_s17   ;;  %s799_s16 = sphi %s841_s16, %s1072_s16   ;;  %s795_s15 = sphi %s839_s15, %s1071_s15   ;;  %s791_s14 = sphi %s837_s14, %s1070_s14   ;;  %s787_s13 = sphi %s835_s13, %s1069_s13   ;;  %s783_s12 = sphi %s833_s12, %s1068_s12  }
   0xa   : > { %p56_p0 = scmp.ne.s32.totalorder %s787_s13, %s783_s12  ;;  %p867_p1 = scmp.eq.s32.totalorder %s483_s18, 0 }
   0xb   : > { %p871_p2 = scmp.eq.s32.totalorder %s483_s18, 1  ;;  %p114_p3 = scmp.eq.s32.totalorder %s484_s19, 1 }
   0xc   : > { %p877_p4 = por %p867_p1, %p56_p0  ;;  %p485_p5 = scmp.ge.s32.totalorder %s803_s17, 1 }
   0xd   : > { %p882_p6 = por %p114_p3, %p56_p0  ;;  %p149_p7 = scmp.lt.s32.totalorder %s803_s17, 3 }
   0xe   : > { %s1058_s22 = scalar_select %p877_p4, 1, 0 }
   0xf   : > { %s1059_s23 = scalar_select %p882_p6, 1, 0 }
  0x10   : > { %p887_p8 = pnand %p485_p5, %p149_p7  ;;  %s805_s25 = smov [#allocation5]  }
  0x11   : > { %s163_s26 = sshll.u32 %s805_s25, 4  ;;  %s33_s28 = sadd.s32 1, %s799_s16  ;;  %s164_s26 = int_to_ptr.vmem [resolvable:$true] %s163_s26 }
  0x12   : > { %p563_p9 = pneg %p887_p8  ;;  %s646_s29 = scalar_lea.vmem %s164_s26, 2048 }
  0x13   : > { %p647_p13 = scmp.ne.s32.totalorder %s164_s26, %s646_s29  ;;  %p654_p5 = scmp.lt.s32.totalorder %s164_s26, %s164_s26 }
  0x14   : > { %p896_p11 = pnand %p563_p9, %p867_p1  ;;  %p655_p7 = scmp.lt.s32.totalorder %s646_s29, %s646_s29 }
  0x16   : > { %p637_p12 = pneg %p896_p11  ;;  %p656_p6 = por %p655_p7, %p654_p5 }
  0x18   : > { %p649_p0 = pnand %p647_p13, %p637_p12 }
  0x1a   : > { %p650_p3 = pneg %p649_p0 }
  0x1c   : > { %p657_p4 = pnand %p656_p6, %p650_p3 }
  0x1e   : > { %660 = shalt.err (!%p657_p4)
}
  0x1f   : > { %s806_s30 = smov 128   ;;  %s807_s4 = smov 8  }
  0x20   : > { %566 = dma.hbm_to_vmem [thread:$0]  (!%p896_p11), %s1052_s1, 2048, %s164_s26, [#allocation6], %s806_s30, %s806_s30, %s807_s4  }
  0x21   : > { %p34_p6 = scmp.ge.s32.totalorder %s33_s28, 2  ;;  %s43_s7 = sadd.s32 1, %s791_s14 }
  0x22   : > { %p50_p4 = scmp.ne.s32.totalorder %s791_s14, %s787_s13  ;;  %p51_p9 = scmp.eq.s32.totalorder %s803_s17, 0 }
  0x23   : > { %s1074_s28 = smov (%p34_p6, %s33_s28), 0  ;;  %p579_p0 = scmp.lt.s32.totalorder %s803_s17, 2 }
  0x24   : > { %p914_p12 = por %p51_p9, %p50_p4  ;;  %p920_p13 = por %p871_p2, %p50_p4 }
  0x25   : > { %s40_s10 = ssub.s32 %s799_s16, %s1074_s28  ;;  %s177_s11 = sand.u32 1, %s791_s14  }
  0x26   : > { %p41_p11 = scmp.eq.s32.totalorder %s40_s10, 0  ;;  %s488_s18 = sshll.u32 %s177_s11, 3 }
  0x27   : > { %s489_s25 = sshll.u32 %s799_s16, 7  ;;  %s181_s30 = scalar_lea.vmem [#allocation2], %s488_s18 }
  0x28   : > { %s929_s19 = scalar_select %p41_p11, %s791_s14, %s43_s7  }
  0x29   : > { %s186_s29 = scalar_lea.hbm %s1051_s0, %s489_s25  ;;  %s188_s4 = sshll.u32 %s181_s30, 4  ;;  %s189_s4 = int_to_ptr.vmem [resolvable:$true] %s188_s4 }
  0x2a   : > { %p937_p2 = pnand %p579_p0, %p914_p12  ;;  %s178_s5 = scalar_lea.sflag [#allocation3], %s177_s11 }
  0x2b   : > { %s674_s6 = scalar_lea.vmem %s189_s4, 128  ;;  %s808_s7 = smov [#allocation2]  }
  0x2c   : > { %p663_p3 = pneg %p937_p2  ;;  %p675_p5 = scmp.ne.s32.totalorder %s189_s4, %s674_s6 }
  0x2d   : > { %s679_s10 = sshll.u32 %s808_s7, 4  ;;  %s680_s10 = int_to_ptr.vmem [resolvable:$false] %s679_s10 }
  0x2e   : > { %p677_p7 = pnand %p675_p5, %p663_p3  ;;  %s681_s25 = scalar_lea.vmem %s680_s10, 256 }
  0x2f   : > { %p682_p4 = scmp.lt.s32.totalorder %s189_s4, %s680_s10  ;;  %p683_p9 = scmp.lt.s32.totalorder %s681_s25, %s674_s6 }
  0x30   : > { %p678_p6 = pneg %p677_p7 }
  0x31   : > { %p684_p11 = por %p683_p9, %p682_p4 }
  0x33   : > { %p685_p10 = pnand %p684_p11, %p678_p6 }
  0x35   : > { %688 = shalt.err (!%p685_p10)
}
  0x36   : > { %570 = dma.hbm_to_vmem [thread:$0]  (!%p937_p2), %s186_s29, 128, %s189_s4, %s178_s5  }
  0x37   : > { %197 = sbr.rel (%p887_p8) target bundleno = 325 (0x145), region = 28  ;;  %s948_s8 = sand.u32 (!%p887_p8), 1, %s787_s13  }
  0x38   : > { %s951_s11 = sshll.u32 (!%p887_p8), %s948_s8, 3  ;;  %s200_s18 = scalar_lea.sflag (!%p887_p8), [#allocation3], %s948_s8 }
  0x39   : > { %s203_s26 = scalar_lea.vmem (!%p887_p8), [#allocation2], %s951_s11  ;;  %p1065_p12 = scmp.ne.s32.totalorder (!%p887_p8), %s1058_s22, 0 }
  0x3c   : > { %766 = dma.done.wait (%p1065_p12), %s200_s18, 128  }
  0x3d   : > { %768 = vsyncadd (%p1065_p12), %s200_s18, 4294967168 }
  0x3e   : > { %770 = dma.done.wait (%p867_p1), [#allocation6], 2048  }
  0x3f   : > { %772 = vsyncadd (%p867_p1), [#allocation6], 4294965248  ;;  %v809_v0 = vmov 0.0   ;;  %vm810_vm0 = vmmov 0   ;;  %v251_v1 = vld [vmem:[#allocation5 + $0x78] sm:$0xff]  ;;  %v250_v2 = vld [vmem:[#allocation5 + $0x70] sm:$0xff] }
  0x40   : > { %518 = vmatprep.subr.mxu0 %v809_v0  ;;  %550 = vmatprep.mubr.msk.f32.mxu0 %vm810_vm0, %v809_v0  ;;  %v249_v3 = vld [vmem:[#allocation5 + $0x68] sm:$0xff]  ;;  %v248_v4 = vld [vmem:[#allocation5 + $0x60] sm:$0xff]  ;;  %v247_v5 = vld [vmem:[#allocation5 + $0x58] sm:$0xff]  ;;  %s227_s20 = scalar_lea.vmem [#allocation7], %s951_s11  ;;  %s497_s24 = sshll.u32 %s795_s15, 7 }
  0x41   : > { %519 = vmatpush3.msra.mxu0 %v251_v1  ;;  %v246_v6 = vld [vmem:[#allocation5 + $0x50] sm:$0xff]  ;;  %v245_v7 = vld [vmem:[#allocation5 + $0x48] sm:$0xff]  ;;  %v244_v8 = vld [vmem:[#allocation5 + $0x40] sm:$0xff]  ;;  %s345_s22 = sshll.u32 %s227_s20, 4  ;;  %s234_s27 = scalar_lea.vmem [#allocation8], %s951_s11  ;;  %s967_s22 = int_to_ptr.vmem [resolvable:$true] %s345_s22 }
  0x42   : > { %520 = vmatprep.subr.mxu0 %v809_v0  ;;  %v243_v9 = vld [vmem:[#allocation5 + $0x38] sm:$0xff]  ;;  %v242_v10 = vld [vmem:[#allocation5 + $0x30] sm:$0xff]  ;;  %v241_v11 = vld [vmem:[#allocation5 + $0x28] sm:$0xff]  ;;  %s359_s29 = sshll.u32 %s234_s27, 4  ;;  %s975_s21 = scalar_lea.hbm %s1053_s2, %s497_s24  ;;  %s982_s29 = int_to_ptr.vmem [resolvable:$true] %s359_s29 }
  0x43   : > { %521 = vmatpush3.msra.mxu0 %v250_v2  ;;  %v240_v12 = vld [vmem:[#allocation5 + $0x20] sm:$0xff]  ;;  %v239_v13 = vld [vmem:[#allocation5 + $0x18] sm:$0xff]  ;;  %v238_v14 = vld [vmem:[#allocation5 + $0x10] sm:$0xff]  ;;  %s980_s15 = scalar_lea.hbm %s1054_s3, %s497_s24  ;;  %s326_s7 = scalar_lea.sflag [#allocation4], %s948_s8 }
  0x44   : > { %522 = vmatprep.subr.mxu0 %v809_v0  ;;  %v237_v15 = vld [vmem:[#allocation5 + $0x8] sm:$0xff]  ;;  %v236_v16 = vld [vmem:[#allocation5] sm:$0xff]  ;;  %v235_v17 = vld [vmem:[%s203_s26] sm:$0xff]  ;;  %s689_s10 = scalar_lea.vmem %s967_s22, 128  ;;  %s811_s25 = smov [#allocation7]  }
  0x45   : > { %523 = vmatpush3.msra.mxu0 %v249_v3  ;;  %p690_p1 = scmp.ne.s32.totalorder %s967_s22, %s689_s10  ;;  %s693_s18 = sshll.u32 %s811_s25, 4  ;;  %s694_s18 = int_to_ptr.vmem [resolvable:$false] %s693_s18 }
  0x46   : > { %524 = vmatprep.subr.mxu0 %v809_v0  ;;  %s695_s26 = scalar_lea.vmem %s694_s18, 256  ;;  %p696_p0 = scmp.lt.s32.totalorder %s967_s22, %s694_s18 }
  0x47   : > { %525 = vmatpush3.msra.mxu0 %v248_v4  ;;  %p691_p8 = pnand %p690_p1, %p920_p13  ;;  %p697_p2 = scmp.lt.s32.totalorder %s695_s26, %s689_s10 }
  0x48   : > { %526 = vmatprep.subr.mxu0 %v809_v0 }
  0x49   : > { %527 = vmatpush3.msra.mxu0 %v247_v5  ;;  %p692_p10 = pneg %p691_p8  ;;  %p698_p3 = por %p697_p2, %p696_p0 }
  0x4a   : > { %528 = vmatprep.subr.mxu0 %v809_v0 }
  0x4b   : > { %529 = vmatpush3.msra.mxu0 %v246_v6  ;;  %p699_p5 = pnand %p698_p3, %p692_p10 }
  0x4c   : > { %530 = vmatprep.subr.mxu0 %v809_v0 }
  0x4d   : > { %531 = vmatpush3.msra.mxu0 %v245_v7 }
  0x4e   : > { %532 = vmatprep.subr.mxu0 %v809_v0 }
  0x4f   : > { %533 = vmatpush3.msra.mxu0 %v244_v8 }
  0x50   : > { %534 = vmatprep.subr.mxu0 %v809_v0 }
  0x51   : > { %535 = vmatpush3.msra.mxu0 %v243_v9 }
  0x52   : > { %536 = vmatprep.subr.mxu0 %v809_v0 }
  0x53   : > { %537 = vmatpush3.msra.mxu0 %v242_v10 }
  0x54   : > { %538 = vmatprep.subr.mxu0 %v809_v0 }
  0x55   : > { %539 = vmatpush3.msra.mxu0 %v241_v11 }
  0x56   : > { %540 = vmatprep.subr.mxu0 %v809_v0 }
  0x57   : > { %541 = vmatpush3.msra.mxu0 %v240_v12 }
  0x58   : > { %542 = vmatprep.subr.mxu0 %v809_v0 }
  0x59   : > { %543 = vmatpush3.msra.mxu0 %v239_v13 }
  0x5a   : > { %544 = vmatprep.subr.mxu0 %v809_v0 }
  0x5b   : > { %545 = vmatpush3.msra.mxu0 %v238_v14 }
  0x5c   : > { %546 = vmatprep.subr.mxu0 %v809_v0 }
  0x5d   : > { %547 = vmatpush3.msra.mxu0 %v237_v15 }
  0x5e   : > { %548 = vmatprep.subr.mxu0 %v809_v0 }
  0x5f   : > { %549 = vmatpush3.msra.mxu0 %v236_v16 }
  0x60   : > { %551 = vmatmul.mubr.f32.vlgmr.msra.gmra.mxu0 %v235_v17 }
 0x120   : > { %v318_v18 = vpop.f32.mrf.mxu0 }
 0x121   : > { %v322_v19 = vmul.f32 %v318_v18, %v318_v18  ;;  %324 = vst [vmem:[%s227_s20] sm:$0xff] %v318_v18 }
 0x122   : > { %v552_v20 = vpop.f32.mrf.mxu0 }
 0x123   : > { %702 = shalt.err (!%p699_p5)
}
 0x124   : > { %s703_s20 = scalar_lea.hbm %s975_s21, 128  ;;  %s707_s4 = scalar_lea.hbm %s1053_s2, 256 }
 0x125   : > { %p704_p7 = scmp.ne.s32.totalorder %s975_s21, %s703_s20  ;;  %p708_p9 = scmp.lt.s32.totalorder %s975_s21, %s1053_s2 }
 0x126   : > { %p709_p11 = scmp.lt.s32.totalorder %s707_s4, %s703_s20 }
 0x127   : > { %p705_p6 = pnand %p704_p7, %p920_p13 }
 0x128   : > { %p710_p12 = por %p709_p11, %p708_p9 }
 0x129   : > { %p706_p4 = pneg %p705_p6 }
 0x12b   : > { %p711_p1 = pnand %p710_p12, %p706_p4 }
 0x12d   : > { %714 = shalt.err (!%p711_p1)
}
 0x12e   : > { %559 = dma.vmem_to_hbm [thread:$0]  (%p920_p13), %s967_s22, 128, %s975_s21, %s326_s7   ;;  %323 = vst [vmem:[%s234_s27] sm:$0xff] %v322_v19 }
 0x12f   : > { %s331_s10 = scalar_lea.sflag [#allocation9], %s948_s8  ;;  %s715_s25 = scalar_lea.vmem %s982_s29, 128 }
 0x130   : > { %p716_p8 = scmp.ne.s32.totalorder %s982_s29, %s715_s25  ;;  %s812_s18 = smov [#allocation8]  }
 0x131   : > { %s719_s26 = sshll.u32 %s812_s18, 4  ;;  %s720_s26 = int_to_ptr.vmem [resolvable:$false] %s719_s26 }
 0x132   : > { %p717_p10 = pnand %p716_p8, %p920_p13  ;;  %s721_s20 = scalar_lea.vmem %s720_s26, 256 }
 0x133   : > { %p722_p2 = scmp.lt.s32.totalorder %s982_s29, %s720_s26  ;;  %p723_p3 = scmp.lt.s32.totalorder %s721_s20, %s715_s25 }
 0x134   : > { %p718_p0 = pneg %p717_p10 }
 0x135   : > { %p724_p5 = por %p723_p3, %p722_p2 }
 0x137   : > { %p725_p7 = pnand %p724_p5, %p718_p0 }
 0x139   : > { %728 = shalt.err (!%p725_p7)
}
 0x13a   : > { %s729_s11 = scalar_lea.hbm %s980_s15, 128  ;;  %s733_s27 = scalar_lea.hbm %s1054_s3, 256 }
 0x13b   : > { %p730_p6 = scmp.ne.s32.totalorder %s980_s15, %s729_s11  ;;  %p734_p11 = scmp.lt.s32.totalorder %s980_s15, %s1054_s3 }
 0x13c   : > { %p735_p12 = scmp.lt.s32.totalorder %s733_s27, %s729_s11 }
 0x13d   : > { %p731_p4 = pnand %p730_p6, %p920_p13 }
 0x13e   : > { %p736_p1 = por %p735_p12, %p734_p11 }
 0x13f   : > { %p732_p9 = pneg %p731_p4 }
 0x141   : > { %p737_p8 = pnand %p736_p1, %p732_p9 }
 0x143   : > { %740 = shalt.err (!%p737_p8)
}
 0x144   : > { %560 = dma.vmem_to_hbm [thread:$0]  (%p920_p13), %s982_s29, 128, %s980_s15, %s331_s10  }
 0x145 PF: > { %s371_s24 = sand.u32 1, %s783_s12   ;;  %p1066_p10 = scmp.ne.s32.totalorder %s1059_s23, 0 }
 0x146   : > { %p1067_p0 = scmp.ge.s32.totalorder %s803_s17, 2  ;;  %s372_s30 = scalar_lea.sflag [#allocation4], %s371_s24 }
 0x148   : > { %p572_p2 = pnand %p1067_p0, %p1066_p10 }
 0x14a   : > { %p573_p3 = pneg %p572_p2 }
 0x14c   : > { %774 = dma.done.wait (%p573_p3), %s372_s30, 128  }
 0x14d   : > { %776 = vsyncadd (%p573_p3), %s372_s30, 4294967168  ;;  %s381_s4 = scalar_lea.sflag [#allocation9], %s371_s24 }
 0x14e   : > { %778 = dma.done.wait (%p573_p3), %s381_s4, 128  }
 0x14f   : > { %780 = vsyncadd (%p573_p3), %s381_s4, 4294967168  ;;  %s24_s17 = sadd.s32 1, %s803_s17   ;;  %s1068_s12 = smov %s787_s13 }
 0x150   : > { %p21_p5 = scmp.ge.s32.totalorder %s24_s17, 4   ;;  %s1069_s13 = smov %s791_s14 }
 0x151   : > { %s1070_s14 = smov %s929_s19  ;;  %s1071_s15 = smov %s799_s16 }
 0x152   : > { %s1072_s16 = smov %s1074_s28  ;;  %23 = sbr.rel (!%p21_p5) target bundleno = 9 (0x9), region = 95 }
 0x157   :  { %386 = vsyncpa [#allocation3], 1 }
 0x158   :  { %388 = vsyncpa [#allocation3 + $0x1], 1 }
 0x159   :  { %389 = vsyncpa [#allocation6], 1 }
 0x15a   :  { %390 = vsyncpa [#allocation4], 1 }
 0x15b   :  { %392 = vsyncpa [#allocation4 + $0x1], 1 }
 0x15c   :  { %393 = vsyncpa [#allocation9], 1 }
 0x15d   :  { %395 = vsyncpa [#allocation9 + $0x1], 1 }

</bundles_post_ra>
